<compile_context>
chip_gen: v5e
topology: v5e:2x2
jax: 0.10.0
libtpu: 0.0.40
codegen_flags: <defaults>
</compile_context>

<pallas_src>
import math

import jax
import jax.numpy as jnp
from jax import lax
from jax.experimental import pallas as pl
from jax.experimental.pallas import tpu as pltpu


def _round_up(x, m):
    return ((x + m - 1) // m) * m


def _lcm(a, b):
    return a * b // math.gcd(a, b)


def _make_loss_kernel(temperature, tm, b_real, b_pad):
    inv_temp = float(1.0 / float(temperature))

    def loss_kernel(q_ref, kt_ref, lcol_ref, lrow_ref, out_ref):
        i = pl.program_id(0)
        row_start = i * tm

        # (TM, Bp) similarities: bf16 MXU matmul against the pre-transposed keys,
        # f32 accumulation.
        sims = jnp.dot(q_ref[...], kt_ref[...], preferred_element_type=jnp.float32)

        # Fused diagonal + padded-column predicate. Row index stays a (TM, 1)
        # vector so the only full-tile compares are the two on `col` and the
        # label equality below.
        col = lax.broadcasted_iota(jnp.int32, (tm, b_pad), 1)
        row_idx = row_start + lax.broadcasted_iota(jnp.int32, (tm, 1), 0)
        invalid = jnp.logical_or(col == row_idx, col >= b_real)

        # Constant stabilizer: features are L2-normalized so sims <= ~1 (bf16
        # rounding may push it to ~1.01 -> exponent <= ~0.1/T, harmless at T=0.1).
        # log_softmax is shift-invariant per row, so this matches the reference
        # row-max shift exactly up to rounding.
        logits = jnp.where(invalid, jnp.float32(-1e9), (sims - 1.0) * inv_temp)

        # Positive mask: same label, not self, valid (un-padded) column.
        pos = jnp.logical_and(lcol_ref[...] == lrow_ref[...],
                              jnp.logical_not(invalid))
        mask = pos.astype(jnp.float32)

        # Cross entropy with soft targets via
        #   -sum_j p_ij log_q_ij = lse_i - (sum_{j in pos} logits_ij) / n_i
        # (no materialized p or log_q tensors).
        # TODO(synk): on v6e/v7x the exp could run in bf16 (EUP supports bf16
        # there) for ~2x transcendental throughput when D is small (EUP-bound).
        lse = jnp.log(jnp.sum(jnp.exp(logits), axis=-1, keepdims=True))   # (TM, 1)
        n_i = jnp.sum(mask, axis=-1, keepdims=True)                       # (TM, 1)
        pos_sum = jnp.sum(mask * logits, axis=-1, keepdims=True)          # (TM, 1)

        # Rows with no positives (padded rows, unique labels, or the degenerate
        # B==1 case where lse is -inf) contribute exactly 0, matching p == 0 in
        # the reference -- and never produce NaN.
        row_valid = jnp.logical_and(n_i > 0.0, row_idx < b_real)
        per_row = jnp.where(row_valid,
                            lse - pos_sum / jnp.maximum(n_i, 1.0),
                            jnp.float32(0.0))

        partial = jnp.sum(per_row)
        out_ref[...] = jnp.broadcast_to(partial, (1, 1, 128)).astype(jnp.float32)

    return loss_kernel


def multi_pos_con_loss(feats, labels, temperature: float = 0.1, row_tile: int = 256):
    """StableRep MultiPosConLoss forward. feats: (B, D) float, labels: (B,) int."""
    b, d = feats.shape

    # Lane-friendly feature padding (zero pad preserves norms and dot products).
    d_pad = max(128, _round_up(d, 128))

    # Row tile: multiple of 16 (bf16 sublane packing). Pad rows/cols to a common
    # multiple of the tile and 128 lanes so the key matrix stays lane-dense.
    tm = _round_up(min(int(row_tile), max(b, 16)), 16)
    b_pad = _round_up(b, _lcm(tm, 128))
    n_tiles = b_pad // tm

    # Normalize + cast OUTSIDE the kernel; kernel only sees normalized bf16 keys.
    f32 = feats.astype(jnp.float32)
    f32 = f32 / jnp.maximum(
        jnp.sqrt(jnp.sum(f32 * f32, axis=-1, keepdims=True)), 1e-12)  # F.normalize eps
    keys_bf = f32.astype(jnp.bfloat16)
    keys = jnp.zeros((b_pad, d_pad), jnp.bfloat16).at[:b, :d].set(keys_bf)
    keys_t = jnp.zeros((d_pad, b_pad), jnp.bfloat16).at[:d, :b].set(keys_bf.T)

    # Padded label slots get -1 (never matches real labels; also gated by masks).
    labels_p = jnp.full((b_pad,), -1, jnp.int32).at[:b].set(labels.astype(jnp.int32))
    lcol = labels_p.reshape(b_pad, 1)
    lrow = labels_p.reshape(1, b_pad)

    def _const_spec(block_shape):
        # Constant-index blocks: single-buffer them (the second pipeline buffer of a
        # block whose index never changes is pure VMEM waste).
        index_map = lambda i, _n=len(block_shape): (0,) * _n
        try:
            return pl.BlockSpec(block_shape, index_map, pipeline_mode=pl.Buffered(1))
        except (TypeError, AttributeError):
            return pl.BlockSpec(block_shape, index_map)

    in_specs = [
        pl.BlockSpec((tm, d_pad), lambda i: (i, 0)),   # query row tile (double-buffered)
        _const_spec((d_pad, b_pad)),                   # resident transposed bf16 keys
        pl.BlockSpec((tm, 1), lambda i: (i, 0)),       # labels, column layout
        _const_spec((1, b_pad)),                       # labels, row layout
    ]
    # One independent (1,1,128) partial per row tile -> "parallel" grid axis.
    out_specs = pl.BlockSpec((1, 1, 128), lambda i: (i, 0, 0))
    out_shape = jax.ShapeDtypeStruct((n_tiles, 1, 128), jnp.float32)

    # VMEM estimate: resident keys^T (1 buffer) + double-buffered query/label tiles
    # + ~6 live (TM, Bp) f32 temporaries (sims/logits/mask/exp/iota/compares).
    vmem_est = (d_pad * b_pad * 2
                + 2 * tm * d_pad * 2
                + 2 * tm * 128 * 4
                + 2 * 8 * b_pad * 4
                + 2 * 128 * 4
                + 6 * tm * b_pad * 4)
    try:
        vmem_cap = int(pltpu.get_tpu_info().vmem_capacity_bytes)
    except Exception:
        vmem_cap = 64 * 1024 * 1024  # conservative floor (v7x per-core VMEM)
    vmem_limit = int(min(max(int(vmem_est * 1.5), 32 * 1024 * 1024),
                         vmem_cap - 2 * 1024 * 1024))

    cost = pl.CostEstimate(
        flops=2 * b_pad * b_pad * d_pad,
        transcendentals=b_pad * b_pad,
        bytes_accessed=(2 * b_pad * d_pad * 2 + 2 * b_pad * 4 + n_tiles * 128 * 4),
    )

    partials = pl.pallas_call(
        _make_loss_kernel(temperature, tm, b, b_pad),
        grid=(n_tiles,),
        out_shape=out_shape,
        in_specs=in_specs,
        out_specs=out_specs,
        compiler_params=pltpu.CompilerParams(
            dimension_semantics=("parallel",),   # independent tiles -> megacore on v7x
            vmem_limit_bytes=vmem_limit,
        ),
        cost_estimate=cost,
    )(keys, keys_t, lcol, lrow)

    loss = jnp.sum(partials[:, 0, 0]) / jnp.float32(b)
    return {"loss": loss, "image_loss": loss}


def _reference(feats, labels, temperature=0.1, cast_bf16=False):
    # Pure-JAX mirror of the PyTorch forward (rank 0, single device).
    f = feats / jnp.maximum(jnp.linalg.norm(feats, axis=-1, keepdims=True), 1e-12)
    if cast_bf16:
        f = f.astype(jnp.bfloat16)
    b = f.shape[0]
    logits = jnp.dot(f, f.T, preferred_element_type=jnp.float32) / temperature
    mask = (labels[:, None] == labels[None, :]).astype(jnp.float32)
    logits_mask = 1.0 - jnp.eye(b, dtype=jnp.float32)
    mask = mask * logits_mask
    logits = logits - (1.0 - logits_mask) * 1e9
    logits = logits - jnp.max(logits, axis=-1, keepdims=True)
    log_q = logits - jax.scipy.special.logsumexp(logits, axis=-1, keepdims=True)
    p = mask / jnp.maximum(mask.sum(-1, keepdims=True), 1.0)
    return -jnp.mean(jnp.sum(p * log_q, axis=-1))


if __name__ == "__main__":
    key = jax.random.PRNGKey(0)
    kf, kl = jax.random.split(key)

    # B deliberately not a multiple of the tile -> exercises padded rows/cols;
    # small row tile -> 8 parallel grid steps with per-tile partials.
    B, D = 20, 32
    feats = jax.random.normal(kf, (B, D), dtype=jnp.float32)
    labels = jax.random.randint(kl, (B,), 0, 4, dtype=jnp.int32)  # repeated labels

    out = multi_pos_con_loss(feats, labels, temperature=0.1, row_tile=16)
    loss = jax.block_until_ready(out["loss"])

    # Tight check against a reference that also feeds bf16 into the matmul.
    ref_bf16 = _reference(feats, labels, 0.1, cast_bf16=True)
    assert jnp.allclose(loss, ref_bf16, atol=1e-3, rtol=1e-3), (loss, ref_bf16)
    # Looser check against the pure-f32 reference (bf16 MXU inputs differ slightly).
    ref_f32 = _reference(feats, labels, 0.1, cast_bf16=False)
    assert jnp.allclose(loss, ref_f32, atol=5e-2, rtol=5e-2), (loss, ref_f32)

    # Different tile size (default row_tile) must agree with the small-tile run.
    loss2 = jax.block_until_ready(multi_pos_con_loss(feats, labels, 0.1)["loss"])
    assert jnp.allclose(loss, loss2, atol=1e-4, rtol=1e-4), (loss, loss2)

    # Degenerate batch of 1: every column masked -> loss must be exactly 0 (no NaN).
    loss1 = jax.block_until_ready(
        multi_pos_con_loss(feats[:1], labels[:1], 0.1)["loss"])
    assert bool(jnp.isfinite(loss1)) and jnp.allclose(loss1, 0.0), loss1

    print("KERNEL_OK")
</pallas_src>

<mosaic_0001>
module attributes {stable_mosaic.version = 11 : i64} {
  func.func @loss_kernel(%arg0: i32, %arg1: memref<16x128xbf16, #tpu.memory_space<vmem>>, %arg2: memref<128x128xbf16, #tpu.memory_space<vmem>>, %arg3: memref<16x1xi32, #tpu.memory_space<vmem>>, %arg4: memref<1x128xi32, #tpu.memory_space<vmem>>, %arg5: memref<1x1x128xf32, #tpu.memory_space<vmem>>) attributes {dimension_semantics = [#tpu.dimension_semantics<parallel>], iteration_bounds = array<i64: 8>, scalar_prefetch = 0 : i64, scratch_operands = 0 : i64, tpu.core_type = #tpu.core_type<tc>, window_params = [{transform_indices = @transform_0, window_bounds = array<i64: 16, 128>}, {pipeline_mode = #tpu.pipeline_mode<synchronous>, transform_indices = @transform_1, window_bounds = array<i64: 128, 128>}, {transform_indices = @transform_2, window_bounds = array<i64: 16, 1>}, {pipeline_mode = #tpu.pipeline_mode<synchronous>, transform_indices = @transform_3, window_bounds = array<i64: 1, 128>}, {transform_indices = @transform_4, window_bounds = array<i64: 1, 1, 128>}]} {
    %c16_i32 = arith.constant 16 : i32
    %0 = arith.muli %arg0, %c16_i32 : i32
    %c0 = arith.constant 0 : index
    %c0_0 = arith.constant 0 : index
    %1 = vector.load %arg1[%c0, %c0_0] : memref<16x128xbf16, #tpu.memory_space<vmem>>, vector<16x128xbf16>
    %c0_1 = arith.constant 0 : index
    %c0_2 = arith.constant 0 : index
    %2 = vector.load %arg2[%c0_1, %c0_2] : memref<128x128xbf16, #tpu.memory_space<vmem>>, vector<128x128xbf16>
    %cst = arith.constant dense<0.000000e+00> : vector<16x128xf32>
    %3 = tpu.matmul %1, %2, %cst {dimension_numbers = #tpu.dot_dimension_numbers<[1], [0], [0], [1], [0, 0, 1, 1], [], []>} : vector<16x128xbf16>, vector<128x128xbf16>, vector<16x128xf32> -> vector<16x128xf32>
    %4 = tpu.iota {dimensions = array<i32: 1>} : vector<16x128xi32>
    %5 = tpu.iota {dimensions = array<i32: 0>} : vector<16x1xi32>
    %6 = vector.broadcast %0 : i32 to vector<16x1xi32>
    %7 = arith.addi %6, %5 : vector<16x1xi32>
    %8 = vector.broadcast %7 : vector<16x1xi32> to vector<16x128xi32>
    %9 = arith.cmpi eq, %4, %8 : vector<16x128xi32>
    %c20_i32 = arith.constant 20 : i32
    %10 = vector.broadcast %c20_i32 : i32 to vector<16x128xi32>
    %11 = arith.cmpi sge, %4, %10 : vector<16x128xi32>
    %12 = arith.ori %9, %11 : vector<16x128xi1>
    %cst_3 = arith.constant 1.000000e+00 : f32
    %13 = vector.broadcast %cst_3 : f32 to vector<16x128xf32>
    %14 = arith.subf %3, %13 : vector<16x128xf32>
    %cst_4 = arith.constant 1.000000e+01 : f32
    %15 = vector.broadcast %cst_4 : f32 to vector<16x128xf32>
    %16 = arith.mulf %14, %15 : vector<16x128xf32>
    %cst_5 = arith.constant -1.000000e+09 : f32
    %17 = vector.broadcast %cst_5 : f32 to vector<16x128xf32>
    %18 = arith.select %12, %17, %16 : vector<16x128xi1>, vector<16x128xf32>
    %c0_6 = arith.constant 0 : index
    %c0_7 = arith.constant 0 : index
    %19 = vector.load %arg3[%c0_6, %c0_7] : memref<16x1xi32, #tpu.memory_space<vmem>>, vector<16x1xi32>
    %c0_8 = arith.constant 0 : index
    %c0_9 = arith.constant 0 : index
    %20 = vector.load %arg4[%c0_8, %c0_9] : memref<1x128xi32, #tpu.memory_space<vmem>>, vector<1x128xi32>
    %21 = vector.broadcast %19 : vector<16x1xi32> to vector<16x128xi32>
    %22 = vector.broadcast %20 : vector<1x128xi32> to vector<16x128xi32>
    %23 = arith.cmpi eq, %21, %22 : vector<16x128xi32>
    %cst_10 = arith.constant dense<true> : vector<16x128xi1>
    %24 = arith.xori %12, %cst_10 : vector<16x128xi1>
    %25 = arith.andi %23, %24 : vector<16x128xi1>
    %26 = arith.extui %25 : vector<16x128xi1> to vector<16x128xi32>
    %27 = arith.sitofp %26 : vector<16x128xi32> to vector<16x128xf32>
    %28 = math.exp %18 : vector<16x128xf32>
    %cst_11 = arith.constant dense<0.000000e+00> : vector<16xf32>
    %29 = vector.multi_reduction <add>, %28, %cst_11 [1] : vector<16x128xf32> to vector<16xf32>
    %30 = vector.shape_cast %29 : vector<16xf32> to vector<16x1xf32>
    %31 = math.log %30 : vector<16x1xf32>
    %cst_12 = arith.constant dense<0.000000e+00> : vector<16xf32>
    %32 = vector.multi_reduction <add>, %27, %cst_12 [1] : vector<16x128xf32> to vector<16xf32>
    %33 = vector.shape_cast %32 : vector<16xf32> to vector<16x1xf32>
    %34 = arith.mulf %27, %18 : vector<16x128xf32>
    %cst_13 = arith.constant dense<0.000000e+00> : vector<16xf32>
    %35 = vector.multi_reduction <add>, %34, %cst_13 [1] : vector<16x128xf32> to vector<16xf32>
    %36 = vector.shape_cast %35 : vector<16xf32> to vector<16x1xf32>
    %cst_14 = arith.constant 0.000000e+00 : f32
    %37 = vector.broadcast %cst_14 : f32 to vector<16x1xf32>
    %38 = arith.cmpf ogt, %33, %37 : vector<16x1xf32>
    %c20_i32_15 = arith.constant 20 : i32
    %39 = vector.broadcast %c20_i32_15 : i32 to vector<16x1xi32>
    %40 = arith.cmpi slt, %7, %39 : vector<16x1xi32>
    %41 = arith.andi %38, %40 : vector<16x1xi1>
    %cst_16 = arith.constant 1.000000e+00 : f32
    %42 = vector.broadcast %cst_16 : f32 to vector<16x1xf32>
    %43 = arith.maximumf %33, %42 : vector<16x1xf32>
    %44 = arith.divf %36, %43 : vector<16x1xf32>
    %45 = arith.subf %31, %44 : vector<16x1xf32>
    %cst_17 = arith.constant 0.000000e+00 : f32
    %46 = vector.broadcast %cst_17 : f32 to vector<16x1xf32>
    %47 = arith.select %41, %45, %46 : vector<16x1xi1>, vector<16x1xf32>
    %48 = vector.shape_cast %47 : vector<16x1xf32> to vector<1x16x1xf32>
    %cst_18 = arith.constant dense<0.000000e+00> : vector<1xf32>
    %49 = vector.multi_reduction <add>, %48, %cst_18 [1, 2] : vector<1x16x1xf32> to vector<1xf32>
    %50 = vector.shape_cast %49 : vector<1xf32> to vector<1x1x1xf32>
    %51 = vector.extract %50[0, 0, 0] : f32 from vector<1x1x1xf32>
    %52 = vector.broadcast %51 : f32 to vector<1x1x128xf32>
    %c0_19 = arith.constant 0 : index
    %c0_20 = arith.constant 0 : index
    %c0_21 = arith.constant 0 : index
    %53 = vector.load %arg5[%c0_19, %c0_20, %c0_21] : memref<1x1x128xf32, #tpu.memory_space<vmem>>, vector<1x1x128xf32>
    tpu.vector_store %arg5[%c0_19, %c0_20, %c0_21], %52 {strides = array<i32>} : memref<1x1x128xf32, #tpu.memory_space<vmem>>, vector<1x1x128xf32>,
    return
  }
  func.func @transform_0(%arg0: i32) -> (i32, i32) {
    %c0_i32 = arith.constant 0 : i32
    %c0_i32_0 = arith.constant 0 : i32
    return %arg0, %c0_i32 : i32, i32
  }
  func.func @transform_1(%arg0: i32) -> (i32, i32) {
    %c0_i32 = arith.constant 0 : i32
    %c0_i32_0 = arith.constant 0 : i32
    %c0_i32_1 = arith.constant 0 : i32
    return %c0_i32, %c0_i32_0 : i32, i32
  }
  func.func @transform_2(%arg0: i32) -> (i32, i32) {
    %c0_i32 = arith.constant 0 : i32
    %c0_i32_0 = arith.constant 0 : i32
    return %arg0, %c0_i32 : i32, i32
  }
  func.func @transform_3(%arg0: i32) -> (i32, i32) {
    %c0_i32 = arith.constant 0 : i32
    %c0_i32_0 = arith.constant 0 : i32
    %c0_i32_1 = arith.constant 0 : i32
    return %c0_i32, %c0_i32_0 : i32, i32
  }
  func.func @transform_4(%arg0: i32) -> (i32, i32, i32) {
    %c0_i32 = arith.constant 0 : i32
    %c0_i32_0 = arith.constant 0 : i32
    %c0_i32_1 = arith.constant 0 : i32
    return %arg0, %c0_i32, %c0_i32_0 : i32, i32, i32
  }
}

</mosaic_0001>

<bundles_post_ra>
// kernel: tpu_custom_call.1
= control target key start
LH: loop header
LB: loop body
LE: loop exit
PB: predicated region body
PF: predicated region fallthrough
CT: control target
= control target key end

     0   :  { %9 = vsyncpa [#allocation3], 0  ;;  %s853_s0 = inlined_call_operand.vmem [shape: bf16[128,128], index: 0, kind: input, shape index: {}]   ;;  %s854_s1 = inlined_call_operand.vmem [shape: bf16[128,128], index: 1, kind: input, shape index: {}]   ;;  %s855_s2 = inlined_call_operand.vmem [shape: s32[128,1], index: 2, kind: input, shape index: {}]   ;;  %s856_s3 = inlined_call_operand.vmem [shape: s32[1,128], index: 3, kind: input, shape index: {}]   ;;  %s857_s4 = inlined_call_operand.hbm [shape: f32[8,1,128], index: 4, kind: output, shape index: {}]  }
   0x1   :  { %11 = vsyncpa [#allocation3 + $0x1], 0  ;;  %s714_s15 = smov 0   ;;  %s716_s16 = smov 0  }
   0x2   :  { %s718_s17 = smov 0   ;;  %s720_s18 = smov 0  }
   0x3 LB: > { %s735_s19 = sadd.s32 4294967295, %s684_s18   ;;  %s504_s20 = sadd.s32 4294967294, %s684_s18   ;;  %s684_s18 = sphi %s720_s18, %s867_s18   ;;  %s680_s17 = sphi %s718_s17, %s866_s17   ;;  %s676_s16 = sphi %s716_s16, %s865_s16   ;;  %s672_s15 = sphi %s714_s15, %s864_s15  }
   0x4   : > { %s739_s21 = sadd.s32 1, %s684_s18   ;;  %s118_s22 = sadd.s32 1, %s680_s17 }
   0x5   : > { %s115_s23 = ssub.s32 %s684_s18, %s739_s21  ;;  %p128_p0 = scmp.ne.s32.totalorder %s680_s17, %s676_s16 }
   0x6   : > { %p116_p1 = scmp.eq.s32.totalorder %s115_s23, 0  ;;  %p129_p2 = scmp.eq.s32.totalorder %s735_s19, 7 }
   0x7   : > { %p134_p3 = scmp.ne.s32.totalorder %s676_s16, %s672_s15  ;;  %p135_p4 = scmp.eq.s32.totalorder %s504_s20, 7 }
   0x8   : > { %s750_s24 = scalar_select %p116_p1, %s680_s17, %s118_s22  }
   0x9   : > { %p752_p5 = por %p129_p2, %p128_p0  ;;  %p756_p6 = por %p135_p4, %p134_p3 }
   0xa   : > { %p507_p7 = scmp.ge.s32.totalorder %s684_s18, 1  ;;  %p177_p8 = scmp.lt.s32.totalorder %s684_s18, 9 }
   0xc   : > { %p178_p9 = pnand %p507_p7, %p177_p8 }
   0xd   : > { %s508_s29 = sshll.u32 (!%p178_p9), %s735_s19, 1  ;;  %s512_s10 = sshll.u32 (!%p178_p9), %s735_s19, 4 }
   0xe   : > { %181 = sbr.rel (%p178_p9) target bundleno = 512 (0x200), region = 36  ;;  %p208_p10 = scmp.lt.s32.totalorder (!%p178_p9), %s508_s29, 15 }
   0xf   : > { %s205_s12 = sand.u32 (!%p178_p9), 1, %s676_s16   ;;  %s433_s20 = scalar_lea.hbm (!%p178_p9), %s857_s4, %s735_s19 }
  0x10   : > { %s206_s22 = scalar_lea.vmem (!%p178_p9), [#allocation2], %s205_s12  ;;  %s437_s27 = sshll.u32 (!%p178_p9), %s433_s20, 4  ;;  %s438_s27 = int_to_ptr.hbm [resolvable:$true] %s437_s27 }
  0x11   : > { %s435_s23 = sshll.u32 (!%p178_p9), %s206_s22, 4  ;;  %s636_s5 = sshra.s32 (!%p178_p9), %s438_s27, 4  ;;  %s436_s23 = int_to_ptr.vmem [resolvable:$true] %s435_s23  ;;  %s637_s5 = int_to_ptr.hbm [resolvable:$true] %s636_s5 }
  0x12   : > { %s642_s19 = scalar_lea.hbm (!%p178_p9), %s857_s4, 8  ;;  %p643_p0 = scmp.lt.s32.totalorder (!%p178_p9), %s637_s5, %s857_s4 }
  0x13   : > { %v563_v0 = vld [vmem:[%s854_s1 + $0x38] sm:$0xff]  ;;  %v686_v1 = vmov 0   ;;  %v562_v2 = vld [vmem:[%s854_s1 + $0x30] sm:$0xff]  ;;  %s869_s29 = smov (!%p208_p10, %s508_s29), 15  ;;  %v561_v3 = vld [vmem:[%s854_s1 + $0x28] sm:$0xff]  ;;  %v306_v12 = vlaneseq  ;;  %v311_v14 = vstv %s512_s10  ;;  %vm687_vm3 = vmmov 1  }
  0x14   : > { %608 = vset.pattern.permute.xlu0 %v686_v1  ;;  %292 = vmatpush.bf16.msra.mxu0 %v563_v0  ;;  %s511_s6 = sshll.u32 %s869_s29, 3  ;;  %v560_v5 = vld [vmem:[%s854_s1 + $0x20] sm:$0xff]  ;;  %v559_v7 = vld [vmem:[%s854_s1 + $0x18] sm:$0xff]  ;;  %v558_v8 = vld [vmem:[%s854_s1 + $0x10] sm:$0xff]  ;;  %s509_s30 = sshll.u32 %s869_s29, 2  ;;  %v688_v22 = vmov 0.0  }
  0x15   : > { %s217_s11 = scalar_lea.vmem %s855_s2, %s511_s6  ;;  %v557_v9 = vld [vmem:[%s854_s1 + $0x8] sm:$0xff]  ;;  %v556_v10 = vld [vmem:[%s854_s1] sm:$0xff]  ;;  %s211_s9 = scalar_lea.vmem %s853_s0, %s509_s30  ;;  %v309_v13 = vshrl.u32 %v306_v12, 7  ;;  %v307_v15 = vand.u32 127, %v306_v12 }
  0x16   : > { %v325_v4 = vld [vmem:[%s217_s11] sm:$0xff]  ;;  %v326_v6 = vld [vmem:[%s217_s11 + $0x8] sm:$0xff]  ;;  %s425_s30 = scalar_lea.sflag [#allocation3], %s205_s12  ;;  %s638_s6 = scalar_lea.hbm %s637_s5, 1 }
  0x17   : > { %329 = vperm.xlu0 %608, %v325_v4   ;;  %v555_v11 = vld [vmem:[%s211_s9] sm:$0xff]  ;;  %v794_v16 = vadd.s32 %v311_v14, %v309_v13  ;;  %vm316_vm1 = vcmp.ge.s32.totalorder %v307_v15, 20  ;;  %v310_v17 = vadd.s32 8, %v309_v13  ;;  %p639_p11 = scmp.ne.s32.totalorder %s637_s5, %s638_s6  ;;  %p644_p1 = scmp.lt.s32.totalorder %s642_s19, %s638_s6 }
  0x18   : > { %293 = vmatpush.bf16.msra.mxu0 %v562_v2  ;;  %v609_v19 = vld [vmem:[%s856_s3] ss:$0 sm:$0xff] }
  0x19   : > { %vm314_vm0 = vcmp.eq.s32.totalorder %v307_v15, %v794_v16  ;;  %v804_v20 = vadd.s32 %v311_v14, %v310_v17  ;;  %p640_p12 = pnand %p639_p11, %p752_p5  ;;  %p645_p2 = por %p644_p1, %p643_p0 }
  0x1a   : > { %vm797_vm2 = vmor %vm314_vm0, %vm316_vm1 }
  0x1b   : > { %vm337_vm4 = vmxor %vm797_vm2, %vm687_vm3  ;;  %vm315_vm6 = vcmp.eq.s32.totalorder %v307_v15, %v804_v20  ;;  %p641_p13 = pneg %p640_p12 }
  0x1c   : > { %294 = vmatpush.bf16.msra.mxu0 %v561_v3  ;;  %vm809_vm8 = vmor %vm315_vm6, %vm316_vm1  ;;  %vm370_vm6 = vcmp.lt.s32.totalorder %v804_v20, 20 }
  0x1d   : > { %vm338_vm9 = vmxor %vm809_vm8, %vm687_vm3  ;;  %p646_p3 = pnand %p645_p2, %p641_p13 }
  0x1f   : > { %332 = vperm.xlu0 %608, %v326_v6  }
  0x20   : > { %295 = vmatpush.bf16.msra.mxu0 %v560_v5 }
  0x24   : > { %296 = vmatpush.bf16.msra.mxu0 %v559_v7 }
  0x28   : > { %297 = vmatpush.bf16.msra.mxu0 %v558_v8 }
  0x2c   : > { %298 = vmatpush.bf16.msra.mxu0 %v557_v9 }
  0x30   : > { %299 = vmatpush.bf16.msra.mxu0 %v556_v10 }
  0x33   : > { %300 = vmatmul.bf16.vlgmr.msra.gmra.mxu0 %v555_v11 }
  0x89   : > { %v330_v21 = vpop.permute.xlu0 %329 }
  0x8a   : > { %vm335_vm5 = vcmp.eq.s32.totalorder %v330_v21, %v609_v19 }
  0x8b   : > { %vm339_vm7 = vmand %vm335_vm5, %vm337_vm4  ;;  %vm369_vm4 = vcmp.lt.s32.totalorder %v794_v16, 20 }
  0x8c   : > { %v551_v23 = vsel %vm339_vm7, 1.0, %v688_v22 }
  0x8d   : > { %357 = vadd.xlane.f32.xlu1 %v551_v23 }
  0x91   : > { %v333_v25 = vpop.permute.xlu0 %332 }
  0x92   : > { %vm336_vm10 = vcmp.eq.s32.totalorder %v333_v25, %v609_v19 }
  0x93   : > { %vm340_vm11 = vmand %vm336_vm10, %vm338_vm9  ;;  %vm409_vm9 = vcmask 7168  }
  0x94   : > { %v552_v26 = vsel %vm340_vm11, 1.0, %v688_v22 }
  0x95   : > { %359 = vadd.xlane.f32.xlu1 %v552_v26 }
  0xb0   : > { %v301_v27 = vpop.f32.mrf.mxu0 }
  0xb1   : > { %v549_v28 = vadd.f32 -1.0, %v301_v27 }
  0xb3   : > { %v321_v29 = vmul.f32 10.0, %v549_v28 }
  0xb5   : > { %v323_v30 = vsel %vm797_vm2, -1e+09, %v321_v29 }
  0xb6   : > { %v361_v31 = vmul.f32 %v551_v23, %v323_v30  ;;  %v345_v32 = vmul.f32 1.442695, %v323_v30 }
  0xb8   : > { %363 = vadd.xlane.f32.xlu0 %v361_v31  ;;  %v303_v33 = vpop.f32.mrf.mxu0  ;;  %610 = vpow2.f32 %v345_v32 }
  0xb9   : > { %v550_v34 = vadd.f32 -1.0, %v303_v33 }
  0xbb   : > { %v322_v35 = vmul.f32 10.0, %v550_v34 }
  0xbd   : > { %v324_v36 = vsel %vm809_vm8, -1e+09, %v322_v35 }
  0xbe   : > { %v611_v37 = vpop.eup %610  ;;  %v347_v38 = vmul.f32 1.442695, %v324_v36  ;;  %v362_v39 = vmul.f32 %v552_v26, %v324_v36 }
  0xbf   : > { %349 = vadd.xlane.f32.xlu2 %v611_v37 }
  0xc0   : > { %612 = vpow2.f32 %v347_v38  ;;  %365 = vadd.xlane.f32.xlu1 %v362_v39 }
  0xc6   : > { %v613_v40 = vpop.eup %612 }
  0xc7   : > { %351 = vadd.xlane.f32.xlu2 %v613_v40 }
 0x100   : > { %v358_v41 = vpop.xlane.xlu1 %357 }
 0x101   : > { %v373_v42 = vmax.f32 %v358_v41, 1.0  ;;  %vm367_vm5 = vcmp.gt.f32.partialorder %v358_v41, 0.0 }
 0x102   : > { %vm371_vm8 = vmand %vm367_vm5, %vm369_vm4 }
 0x103   : > { %614 = vrcp.f32 %v373_v42  ;;  %vm380_vm12 = vweird.f32 %v373_v42  ;;  %v386_v53 = vand.u32 2147483648, %v373_v42  ;;  %v384_v55 = vand.u32 2147483647, %v373_v42 }
 0x105   : > { %v387_v57 = vor.u32 1.1754944e-38, %v386_v53  ;;  %vm385_vm15 = vcmp.eq.f32.partialorder %v384_v55, 8.507059e+37 }
 0x108   : > { %v360_v43 = vpop.xlane.xlu1 %359 }
 0x109   : > { %v374_v44 = vmax.f32 %v360_v43, 1.0  ;;  %v615_v45 = vpop.eup %614  ;;  %vm368_vm7 = vcmp.gt.f32.partialorder %v360_v43, 0.0 }
 0x10a   : > { %v376_v46 = vmul.f32 %v615_v45, %v373_v42  ;;  %vm381_vm13 = vweird.f32 %v615_v45  ;;  %vm372_vm10 = vmand %vm368_vm7, %vm370_vm6 }
 0x10b   : > { %616 = vrcp.f32 %v374_v44  ;;  %vm382_vm14 = vmor %vm380_vm12, %vm381_vm13  ;;  %vm395_vm0 = vweird.f32 %v374_v44  ;;  %v401_v60 = vand.u32 2147483648, %v374_v44  ;;  %v399_v62 = vand.u32 2147483647, %v374_v44 }
 0x10c   : > { %v377_v48 = vsub.f32 1.0, %v376_v46 }
 0x10d   : > { %v402_v3 = vor.u32 1.1754944e-38, %v401_v60  ;;  %vm400_vm3 = vcmp.eq.f32.partialorder %v399_v62, 8.507059e+37 }
 0x10e   : > { %v378_v50 = vmul.f32 %v615_v45, %v377_v48 }
 0x110   : > { %v379_v54 = vadd.f32 %v615_v45, %v378_v50 }
 0x111   : > { %v617_v47 = vpop.eup %616 }
 0x112   : > { %v391_v49 = vmul.f32 %v617_v47, %v374_v44  ;;  %v383_v58 = vsel %vm382_vm14, %v615_v45, %v379_v54  ;;  %vm396_vm1 = vweird.f32 %v617_v47 }
 0x113   : > { %v388_v0 = vsel %vm385_vm15, %v387_v57, %v383_v58  ;;  %vm397_vm2 = vmor %vm395_vm0, %vm396_vm1 }
 0x114   : > { %v392_v52 = vsub.f32 1.0, %v391_v49 }
 0x116   : > { %v393_v56 = vmul.f32 %v617_v47, %v392_v52 }
 0x118   : > { %v394_v61 = vadd.f32 %v617_v47, %v393_v56 }
 0x11a   : > { %v398_v5 = vsel %vm397_vm2, %v617_v47, %v394_v61 }
 0x11b   : > { %v403_v9 = vsel %vm400_vm3, %v402_v3, %v398_v5 }
 0x12b   : > { %v364_v1 = vpop.xlane.xlu0 %363 }
 0x12c   : > { %v389_v4 = vmul.f32 %v388_v0, %v364_v1 }
 0x132   : > { %v350_v51 = vpop.xlane.xlu2 %349 }
 0x133   : > { %618 = vlog2.f32 %v350_v51  ;;  %v366_v6 = vpop.xlane.xlu1 %365 }
 0x134   : > { %v404_v10 = vmul.f32 %v403_v9, %v366_v6 }
 0x139   : > { %v619_v59 = vpop.eup %618 }
 0x13a   : > { %v352_v63 = vpop.xlane.xlu2 %351  ;;  %v354_v2 = vmul.f32 0.6931472, %v619_v59 }
 0x13b   : > { %620 = vlog2.f32 %v352_v63 }
 0x13c   : > { %v405_v7 = vsub.f32 %v354_v2, %v389_v4 }
 0x13e   : > { %v407_v13 = vsel %vm371_vm8, %v405_v7, 0.0 }
 0x13f   : > { %v410_v15 = vsel %vm409_vm9, %v407_v13, 0.0 }
 0x141   : > { %v621_v8 = vpop.eup %620 }
 0x142   : > { %v356_v11 = vmul.f32 0.6931472, %v621_v8 }
 0x144   : > { %v406_v12 = vsub.f32 %v356_v11, %v404_v10 }
 0x146   : > { %v408_v14 = vsel %vm372_vm10, %v406_v12, 0.0 }
 0x147   : > { %v411_v17 = vsel %vm409_vm9, %v408_v14, 0.0 }
 0x148   : > { %v412_v16 = vadd.f32 %v411_v17, %v410_v15 }
 0x14a   : > { %413 = vadd.xlane.f32.xlu2 %v412_v16 }
 0x1bd   : > { %v414_v18 = vpop.xlane.xlu2 %413 }
 0x1be   : > { %v415_v19 = vrot.slane %v414_v18, 4 }
 0x1c0   : > { %v416_v21 = vadd.f32 %v415_v19, %v414_v18 }
 0x1c2   : > { %v417_v22 = vrot.slane %v416_v21, 2 }
 0x1c4   : > { %v418_v20 = vadd.f32 %v417_v22, %v416_v21 }
 0x1c6   : > { %v419_v23 = vrot.slane %v418_v20, 1 }
 0x1c8   : > { %v420_v24 = vadd.f32 %v419_v23, %v418_v20 }
 0x1ca   : > { %564 = vpush %v420_v24 }
 0x1fb   : > { %s565_s28 = spop %564 }
 0x1fc   : > { %v422_v25 = vstv %s565_s28 }
 0x1fd   : > { %423 = vst [vmem:[%s206_s22] sm:$0x1] %v422_v25 }
 0x1fe   : > { %649 = shalt.err (!%p646_p3)
}
 0x1ff   : > { %566 = dma.vmem_to_hbm [thread:$0]  (%p752_p5), %s436_s23, 16, %s438_s27, %s425_s30  }
 0x200 PF: > { %p572_p4 = scmp.ge.s32.totalorder %s684_s18, 2  ;;  %s449_s29 = sand.u32 1, %s672_s15  }
 0x201   : > { %s450_s11 = scalar_lea.sflag [#allocation3], %s449_s29 }
 0x202   : > { %p569_p7 = pnand %p572_p4, %p756_p6 }
 0x204   : > { %p570_p8 = pneg %p569_p7 }
 0x206   : > { %667 = dma.done.wait (%p570_p8), %s450_s11, 16  }
 0x207   : > { %669 = vsyncadd (%p570_p8), %s450_s11, 4294967280  ;;  %p14_p9 = scmp.ge.s32.totalorder %s739_s21, 10   ;;  %s864_s15 = smov %s676_s16 }
 0x208   : > { %s865_s16 = smov %s680_s17  ;;  %s866_s17 = smov %s750_s24 }
 0x209   : > { %s867_s18 = smov %s739_s21  ;;  %16 = sbr.rel (!%p14_p9) target bundleno = 3 (0x3), region = 74 }
 0x20e   :  { %455 = vsyncpa [#allocation3], 1 }
 0x20f   :  { %457 = vsyncpa [#allocation3 + $0x1], 1 }

</bundles_post_ra>
